<compile_context>
chip_gen: v5e
topology: v5e:2x2
jax: 0.10.0
libtpu: 0.0.40
codegen_flags: <defaults>
</compile_context>

<pallas_src>
import jax
import jax.numpy as jnp
from jax.experimental import pallas as pl
from jax.experimental.pallas import tpu as pltpu


def _exponential_kernel(ab_ref, x_ref, o_ref):
    # ab_ref: (2,) float32 in SMEM -> scalar ALU work, free relative to VPU/EUP.
    c = -jnp.abs(ab_ref[0])          # -|a|
    d = -jnp.abs(ab_ref[1])          # -|b|
    # Explicit f32 compute (v5e VPU/EUP have no native bf16 path), cast on store.
    x = x_ref[...].astype(jnp.float32)
    o_ref[...] = (c * jnp.exp(d * x)).astype(o_ref.dtype)


def _choose_layout(n, itemsize, target_tile_bytes=2 * 1024 * 1024):
    """Pick (lanes, rows, tile_rows, pad) for a lane-dense (rows, lanes) view."""
    # sublane packing multiple: 8 for 4-byte, 16 for 2-byte, 32 for 1-byte dtypes
    sub_mult = max(8, 32 // max(itemsize, 1))

    # Widest lane width (multiple of 128) that divides n exactly -> copy-free reshape.
    lanes = None
    for cand in (4096, 2048, 1024, 512, 256, 128):
        if n % cand == 0:
            lanes = cand
            break
    pad = 0
    if lanes is None:
        # Rare fallback: n not a multiple of 128 -> pad up to a full block.
        lanes = 128
        block = lanes * sub_mult
        pad = (-n) % block
    rows = (n + pad) // lanes

    # ~target_tile_bytes per block, tile_rows a multiple of the sublane packing.
    tr = (target_tile_bytes // (lanes * itemsize)) // sub_mult * sub_mult
    tr = max(sub_mult, tr)
    tile_rows = rows if tr >= rows else tr   # full-extent block if array is small
    return lanes, rows, tile_rows, pad


def exponential_forward(a, b, x):
    """y = -|a| * exp(-|b| * x), elementwise; same shape/dtype as x."""
    orig_shape = x.shape
    dtype = x.dtype
    n = int(x.size)
    itemsize = jnp.dtype(dtype).itemsize

    lanes, rows, tile_rows, pad = _choose_layout(n, itemsize)

    flat = x.reshape(-1)
    if pad:
        flat = jnp.pad(flat, (0, pad))       # fallback path only (n % 128 != 0)
    x2d = flat.reshape(rows, lanes)

    # Keep parameters as float32 scalars in SMEM (no precision loss, no casts
    # on the hot path).
    ab = jnp.stack([a, b]).astype(jnp.float32)

    grid = (pl.cdiv(rows, tile_rows),)       # partial last block masked by Pallas
    cost = pl.CostEstimate(
        flops=2 * n, transcendentals=n, bytes_accessed=2 * n * itemsize
    )

    out2d = pl.pallas_call(
        _exponential_kernel,
        out_shape=jax.ShapeDtypeStruct((rows, lanes), dtype),
        grid=grid,
        in_specs=[
            pl.BlockSpec(memory_space=pltpu.MemorySpace.SMEM),    # (a, b) scalars
            pl.BlockSpec((tile_rows, lanes), lambda i: (i, 0)),   # x tile
        ],
        out_specs=pl.BlockSpec((tile_rows, lanes), lambda i: (i, 0)),
        compiler_params=pltpu.CompilerParams(
            dimension_semantics=("parallel",),   # shards grid across v7x's 2 TCs
        ),
        cost_estimate=cost,
    )(ab, x2d)

    y = out2d.reshape(-1)
    if pad:
        y = y[:n]
    return y.reshape(orig_shape)


if __name__ == "__main__":
    key = jax.random.PRNGKey(0)
    k_a, k_b, k_x = jax.random.split(key, 3)

    # Deterministic "parameters" (torch.randn(()) equivalents)
    a = jax.random.normal(k_a, (), dtype=jnp.float32)
    b = jax.random.normal(k_b, (), dtype=jnp.float32)

    # Small NCHW-shaped input
    x = jax.random.normal(k_x, (2, 4, 16, 16), dtype=jnp.float32)

    y = exponential_forward(a, b, x)
    y = jax.block_until_ready(y)

    # Reference check in plain JAX
    y_ref = -jnp.abs(a) * jnp.exp(-jnp.abs(b) * x)
    assert y.shape == x.shape
    assert y.dtype == x.dtype
    assert jnp.allclose(y, y_ref, atol=1e-5, rtol=1e-5)

    print("KERNEL_OK")
</pallas_src>

<mosaic_0001>
module attributes {stable_mosaic.version = 11 : i64} {
  func.func @_exponential_kernel(%arg0: i32, %arg1: memref<2xf32, #tpu.memory_space<smem>>, %arg2: memref<1x2048xf32, #tpu.memory_space<vmem>>, %arg3: memref<1x2048xf32, #tpu.memory_space<vmem>>) attributes {dimension_semantics = [#tpu.dimension_semantics<parallel>], iteration_bounds = array<i64: 1>, scalar_prefetch = 0 : i64, scratch_operands = 0 : i64, tpu.core_type = #tpu.core_type<tc>, window_params = [{transform_indices = @transform_0, window_bounds = array<i64: 2>}, {transform_indices = @transform_1, window_bounds = array<i64: 1, 2048>}, {transform_indices = @transform_2, window_bounds = array<i64: 1, 2048>}]} {
    %c0 = arith.constant 0 : index
    %0 = memref.load %arg1[%c0] : memref<2xf32, #tpu.memory_space<smem>>
    %1 = math.absf %0 : f32
    %cst = arith.constant 0.000000e+00 : f32
    %2 = arith.subf %cst, %1 : f32
    %c1 = arith.constant 1 : index
    %3 = memref.load %arg1[%c1] : memref<2xf32, #tpu.memory_space<smem>>
    %4 = math.absf %3 : f32
    %cst_0 = arith.constant 0.000000e+00 : f32
    %5 = arith.subf %cst_0, %4 : f32
    %c0_1 = arith.constant 0 : index
    %c0_2 = arith.constant 0 : index
    %6 = vector.load %arg2[%c0_1, %c0_2] : memref<1x2048xf32, #tpu.memory_space<vmem>>, vector<1x2048xf32>
    %7 = vector.broadcast %5 : f32 to vector<1x2048xf32>
    %8 = arith.mulf %7, %6 : vector<1x2048xf32>
    %9 = math.exp %8 : vector<1x2048xf32>
    %10 = vector.broadcast %2 : f32 to vector<1x2048xf32>
    %11 = arith.mulf %10, %9 : vector<1x2048xf32>
    %c0_3 = arith.constant 0 : index
    %c0_4 = arith.constant 0 : index
    %12 = vector.load %arg3[%c0_3, %c0_4] : memref<1x2048xf32, #tpu.memory_space<vmem>>, vector<1x2048xf32>
    tpu.vector_store %arg3[%c0_3, %c0_4], %11 {strides = array<i32>} : memref<1x2048xf32, #tpu.memory_space<vmem>>, vector<1x2048xf32>,
    return
  }
  func.func @transform_0(%arg0: i32) -> i32 {
    %c0_i32 = arith.constant 0 : i32
    %c0_i32_0 = arith.constant 0 : i32
    return %c0_i32 : i32
  }
  func.func @transform_1(%arg0: i32) -> (i32, i32) {
    %c0_i32 = arith.constant 0 : i32
    %c0_i32_0 = arith.constant 0 : i32
    return %arg0, %c0_i32 : i32, i32
  }
  func.func @transform_2(%arg0: i32) -> (i32, i32) {
    %c0_i32 = arith.constant 0 : i32
    %c0_i32_0 = arith.constant 0 : i32
    return %arg0, %c0_i32 : i32, i32
  }
}

</mosaic_0001>

<bundles_post_ra>
// kernel: tpu_custom_call.1
= control target key start
LH: loop header
LB: loop body
LE: loop exit
PB: predicated region body
PF: predicated region fallthrough
CT: control target
= control target key end

     0   :  { %7 = vsyncpa [#allocation5], 0  ;;  %s178_s0 = inlined_call_operand.hbm [shape: f32[2], index: 0, kind: input, shape index: {}]   ;;  %s179_s1 = inlined_call_operand.hbm [shape: f32[1,2048], index: 1, kind: input, shape index: {}]   ;;  %s180_s2 = inlined_call_operand.hbm [shape: f32[1,2048], index: 2, kind: output, shape index: {}]  }
   0x1   :  { %8 = vsyncpa [#allocation3], 0 }
   0x2   :  { %9 = vsyncpa [#allocation4], 0  ;;  %s15_s11 = sshll.u32 %s178_s0, 4  ;;  %s24_s14 = sshll.u32 %s179_s1, 4  ;;  %s16_s11 = int_to_ptr.hbm [resolvable:$true] %s15_s11  ;;  %s25_s14 = int_to_ptr.hbm [resolvable:$true] %s24_s14 }
   0x3   :  { %s151_s15 = smov [#allocation2]   ;;  %s152_s16 = smov [#allocation6]  }
   0x4   :  { %18 = dma.hbm_to_smem %s16_s11, 16, %s151_s15, [#allocation5]  }
   0x5   :  { %s26_s17 = sshll.u32 %s152_s16, 4  ;;  %s27_s17 = int_to_ptr.vmem [resolvable:$true] %s26_s17 }
   0x6   :  { %29 = dma.hbm_to_vmem [thread:$0]  %s25_s14, 256, %s27_s17, [#allocation3]  }
   0x7   :  { %145 = dma.done.wait [#allocation5], 16  }
   0x8   :  { %146 = vsyncadd [#allocation5], 4294967280 }
   0x9   :  { %147 = dma.done.wait [#allocation3], 256  }
   0xa   :  { %148 = vsyncadd [#allocation3], 4294967040 }
   0xb   :  { %38 = sfence }
   0xc   :  { %s77_s18 = sld [smem:[#allocation2 + $0x1]]  ;;  %v45_v0 = vld [vmem:[#allocation6] sm:$0xff]  ;;  %v46_v1 = vld [vmem:[#allocation6 + $0x8] sm:$0xff]  ;;  %s153_s22 = smov [#allocation7]  }
   0xd   :  { %s39_s19 = sld [smem:[#allocation2]]  ;;  %s64_s23 = sshll.u32 %s153_s22, 4  ;;  %s65_s23 = int_to_ptr.vmem [resolvable:$true] %s64_s23 }
   0xe   :  { %s66_s26 = sshll.u32 %s180_s2, 4  ;;  %s67_s26 = int_to_ptr.hbm [resolvable:$true] %s66_s26 }
  0x12   :  { %s43_s0 = sand.u32 2147483647, %s77_s18 }
  0x13   :  { %s44_s20 = ssub.f32 0.0, %s43_s0  ;;  %s40_s1 = sand.u32 2147483647, %s39_s19 }
  0x14   :  { %s41_s21 = ssub.f32 0.0, %s40_s1 }
  0x15   :  { %v47_v2 = vstv %s44_s20 }
  0x16   :  { %v48_v3 = vmul.f32 %v47_v2, %v45_v0  ;;  %v49_v4 = vmul.f32 %v47_v2, %v46_v1  ;;  %v54_v7 = vstv %s41_s21 }
  0x18   :  { %v50_v5 = vmul.f32 1.442695, %v48_v3  ;;  %v52_v6 = vmul.f32 1.442695, %v49_v4 }
  0x1a   :  { %81 = vpow2.f32 %v50_v5 }
  0x1b   :  { %83 = vpow2.f32 %v52_v6 }
  0x20   :  { %v82_v8 = vpop.eup %81 }
  0x21   :  { %v84_v9 = vpop.eup %83  ;;  %v55_v10 = vmul.f32 %v82_v8, %v54_v7 }
  0x22   :  { %v56_v11 = vmul.f32 %v84_v9, %v54_v7 }
  0x23   :  { %57 = vst [vmem:[#allocation7] sm:$0xff] %v55_v10 }
  0x24   :  { %58 = vst [vmem:[#allocation7 + $0x8] sm:$0xff] %v56_v11 }
  0x25   :  { %69 = dma.vmem_to_hbm [thread:$0]  %s65_s23, 256, %s67_s26, [#allocation4]  }
  0x26   :  { %149 = dma.done.wait [#allocation4], 256  }
  0x27   :  { %150 = vsyncadd [#allocation4], 4294967040 }
  0x28   :  { %74 = vsyncpa [#allocation3], 1 }
  0x29   :  { %75 = vsyncpa [#allocation4], 1 }
  0x2a   :  { %76 = vsyncpa [#allocation5], 1 }

</bundles_post_ra>
